<compile_context>
chip_gen: v5e
topology: v5e:2x2
jax: 0.10.0
libtpu: 0.0.40
codegen_flags: <defaults>
</compile_context>

<pallas_src>
import jax
import jax.numpy as jnp
from jax.experimental import pallas as pl
from jax.experimental.pallas import tpu as pltpu


def _categorical_kernel(x_ref, wt_ref, b_ref, logits_ref, probs_ref):
    # x_ref:  [TB, Din]    (VMEM)
    # wt_ref: [Din, Dout]  (VMEM, pre-transposed in the wrapper)
    # b_ref:  [1, Dout]    (VMEM)
    x = x_ref[...]
    wt = wt_ref[...]
    b = b_ref[...]

    # Linear: x @ W^T + b  -- W already transposed, direct MXU push, f32 accumulation.
    raw = jnp.dot(x, wt, preferred_element_type=jnp.float32) + b

    # torch.distributions.Categorical(logits=raw):
    #   logits <- raw - logsumexp(raw, -1)   (normalized log-probs)
    #   probs  <- softmax(raw)
    m = jnp.max(raw, axis=-1, keepdims=True)          # XLU lane-reduce
    shifted = raw - m
    e = jnp.exp(shifted)                               # single full-tile EUP pass
    s = jnp.sum(e, axis=-1, keepdims=True)             # XLU lane-reduce
    inv_s = 1.0 / s                                     # [TB, 1] column only (cheap)

    logits_ref[...] = shifted - jnp.log(s)              # normalized log-probs
    probs_ref[...] = e * inv_s                           # exact softmax, reuses `e`


def categorical_forward(x, weight, bias, *, tile_b=1024):
    """Fused Linear -> Categorical. Returns (normalized_logits, probs), both [B, Dout].

    x:      [B, Din]   float32
    weight: [Dout, Din] (torch nn.Linear convention)
    bias:   [Dout]
    """
    B, Din = x.shape
    Dout = weight.shape[0]

    w_t = jnp.transpose(weight)       # [Din, Dout] -- done once in XLA, not in the kernel
    bias2d = bias.reshape(1, Dout)

    out_shape = (
        jax.ShapeDtypeStruct((B, Dout), jnp.float32),  # normalized logits (log-probs)
        jax.ShapeDtypeStruct((B, Dout), jnp.float32),  # probs
    )

    if B <= tile_b or B % 8 != 0:
        # Small batch: no grid. Whole arrays in VMEM, single kernel invocation.
        return pl.pallas_call(
            _categorical_kernel,
            out_shape=out_shape,
            in_specs=[pl.BlockSpec(memory_space=pltpu.MemorySpace.VMEM)] * 3,
            out_specs=tuple(
                pl.BlockSpec(memory_space=pltpu.MemorySpace.VMEM) for _ in range(2)
            ),
        )(x, w_t, bias2d)

    # Large batch: tile over B; weight/bias index_maps return (0, 0) so they stay
    # VMEM-resident across grid steps. Batch axis is "parallel" (megacore sharding).
    tb = tile_b
    while B % tb != 0:   # B is a multiple of 8 here, so this terminates at a valid tile
        tb //= 2
    grid = (B // tb,)

    return pl.pallas_call(
        _categorical_kernel,
        out_shape=out_shape,
        grid=grid,
        in_specs=[
            pl.BlockSpec((tb, Din), lambda i: (i, 0)),
            pl.BlockSpec((Din, Dout), lambda i: (0, 0)),  # resident weight
            pl.BlockSpec((1, Dout), lambda i: (0, 0)),    # resident bias
        ],
        out_specs=(
            pl.BlockSpec((tb, Dout), lambda i: (i, 0)),
            pl.BlockSpec((tb, Dout), lambda i: (i, 0)),
        ),
        compiler_params=pltpu.CompilerParams(
            dimension_semantics=("parallel",),
        ),
    )(x, w_t, bias2d)


def orthogonal_init(key, rows, cols, gain=0.01, dtype=jnp.float32):
    """Deterministic orthogonal init (matches nn.init.orthogonal_ semantics)."""
    n = max(rows, cols)
    a = jax.random.normal(key, (n, min(rows, cols)), dtype=jnp.float32)
    q, r = jnp.linalg.qr(a)
    d = jnp.sign(jnp.diag(r))
    q = q * d[None, :]
    w = q[:rows, :cols] if rows >= cols else q[:cols, :rows].T
    return (gain * w).astype(dtype)


# ----- FixedCategorical method glue (cheap, outside the fused kernel) -----
def mode(probs):
    return jnp.argmax(probs, axis=-1, keepdims=True)             # [B, 1]


def log_probs(normalized_logits, actions):
    # actions: [B, 1] int -> [B, 1] float, matches FixedCategorical.log_probs for 1-D actions.
    return jnp.take_along_axis(normalized_logits, actions, axis=-1)


def sample(key, normalized_logits):
    # TODO(synk): sampling is stochastic host-level jax.random, not part of the fused kernel.
    return jax.random.categorical(key, normalized_logits, axis=-1)[:, None]


if __name__ == "__main__":
    B, num_inputs, num_outputs = 8, 32, 16

    key = jax.random.PRNGKey(0)
    kx, kw, kb = jax.random.split(key, 3)

    x = jax.random.normal(kx, (B, num_inputs), dtype=jnp.float32)
    weight = orthogonal_init(kw, num_outputs, num_inputs, gain=0.01)  # [Dout, Din]
    bias = jnp.zeros((num_outputs,), dtype=jnp.float32)

    # Small-batch (no-grid) path.
    logits, probs = categorical_forward(x, weight, bias)
    jax.block_until_ready((logits, probs))

    ref_raw = x @ weight.T + bias
    ref_logits = ref_raw - jax.scipy.special.logsumexp(ref_raw, axis=-1, keepdims=True)
    ref_probs = jax.nn.softmax(ref_raw, axis=-1)
    assert jnp.allclose(logits, ref_logits, atol=1e-5)
    assert jnp.allclose(probs, ref_probs, atol=1e-5)

    # Larger-batch tiled path (weights resident, "parallel" batch grid axis).
    Bb = 256
    xb = jax.random.normal(kb, (Bb, num_inputs), dtype=jnp.float32)
    logits_b, probs_b = categorical_forward(xb, weight, bias, tile_b=64)
    jax.block_until_ready((logits_b, probs_b))

    ref_raw_b = xb @ weight.T + bias
    ref_logits_b = ref_raw_b - jax.scipy.special.logsumexp(ref_raw_b, axis=-1, keepdims=True)
    ref_probs_b = jax.nn.softmax(ref_raw_b, axis=-1)
    assert jnp.allclose(logits_b, ref_logits_b, atol=1e-5)
    assert jnp.allclose(probs_b, ref_probs_b, atol=1e-5)

    # Exercise the distribution-method glue.
    m = mode(probs)
    lp = log_probs(logits, m)
    s = sample(jax.random.PRNGKey(1), logits)
    jax.block_until_ready((m, lp, s))

    print("KERNEL_OK")
</pallas_src>

<mosaic_0001>
module attributes {stable_mosaic.version = 11 : i64} {
  func.func @_categorical_kernel(%arg0: memref<8x32xf32, #tpu.memory_space<vmem>>, %arg1: memref<32x16xf32, #tpu.memory_space<vmem>>, %arg2: memref<1x16xf32, #tpu.memory_space<vmem>>, %arg3: memref<8x16xf32, #tpu.memory_space<vmem>>, %arg4: memref<8x16xf32, #tpu.memory_space<vmem>>) attributes {dimension_semantics = [], scalar_prefetch = 0 : i64, scratch_operands = 0 : i64, tpu.core_type = #tpu.core_type<tc>} {
    %c0 = arith.constant 0 : index
    %c0_0 = arith.constant 0 : index
    %0 = vector.load %arg0[%c0, %c0_0] : memref<8x32xf32, #tpu.memory_space<vmem>>, vector<8x32xf32>
    %c0_1 = arith.constant 0 : index
    %c0_2 = arith.constant 0 : index
    %1 = vector.load %arg1[%c0_1, %c0_2] : memref<32x16xf32, #tpu.memory_space<vmem>>, vector<32x16xf32>
    %c0_3 = arith.constant 0 : index
    %c0_4 = arith.constant 0 : index
    %2 = vector.load %arg2[%c0_3, %c0_4] : memref<1x16xf32, #tpu.memory_space<vmem>>, vector<1x16xf32>
    %cst = arith.constant dense<0.000000e+00> : vector<8x16xf32>
    %3 = tpu.matmul %0, %1, %cst {dimension_numbers = #tpu.dot_dimension_numbers<[1], [0], [0], [1], [0, 0, 1, 1], [], []>} : vector<8x32xf32>, vector<32x16xf32>, vector<8x16xf32> -> vector<8x16xf32>
    %4 = vector.broadcast %2 : vector<1x16xf32> to vector<8x16xf32>
    %5 = arith.addf %3, %4 : vector<8x16xf32>
    %cst_5 = arith.constant dense<0xFF800000> : vector<8xf32>
    %6 = vector.multi_reduction <maximumf>, %5, %cst_5 [1] : vector<8x16xf32> to vector<8xf32>
    %7 = vector.shape_cast %6 : vector<8xf32> to vector<8x1xf32>
    %8 = vector.broadcast %7 : vector<8x1xf32> to vector<8x16xf32>
    %9 = arith.subf %5, %8 : vector<8x16xf32>
    %10 = math.exp %9 : vector<8x16xf32>
    %cst_6 = arith.constant dense<0.000000e+00> : vector<8xf32>
    %11 = vector.multi_reduction <add>, %10, %cst_6 [1] : vector<8x16xf32> to vector<8xf32>
    %12 = vector.shape_cast %11 : vector<8xf32> to vector<8x1xf32>
    %cst_7 = arith.constant 1.000000e+00 : f32
    %13 = vector.broadcast %cst_7 : f32 to vector<8x1xf32>
    %14 = arith.divf %13, %12 : vector<8x1xf32>
    %15 = math.log %12 : vector<8x1xf32>
    %16 = vector.broadcast %15 : vector<8x1xf32> to vector<8x16xf32>
    %17 = arith.subf %9, %16 : vector<8x16xf32>
    %c0_8 = arith.constant 0 : index
    %c0_9 = arith.constant 0 : index
    %18 = vector.load %arg3[%c0_8, %c0_9] : memref<8x16xf32, #tpu.memory_space<vmem>>, vector<8x16xf32>
    tpu.vector_store %arg3[%c0_8, %c0_9], %17 {strides = array<i32>} : memref<8x16xf32, #tpu.memory_space<vmem>>, vector<8x16xf32>,
    %19 = vector.broadcast %14 : vector<8x1xf32> to vector<8x16xf32>
    %20 = arith.mulf %10, %19 : vector<8x16xf32>
    %c0_10 = arith.constant 0 : index
    %c0_11 = arith.constant 0 : index
    %21 = vector.load %arg4[%c0_10, %c0_11] : memref<8x16xf32, #tpu.memory_space<vmem>>, vector<8x16xf32>
    tpu.vector_store %arg4[%c0_10, %c0_11], %20 {strides = array<i32>} : memref<8x16xf32, #tpu.memory_space<vmem>>, vector<8x16xf32>,
    return
  }
}

</mosaic_0001>

<bundles_post_ra>
// kernel: tpu_custom_call.1
= control target key start
LH: loop header
LB: loop body
LE: loop exit
PB: predicated region body
PF: predicated region fallthrough
CT: control target
= control target key end

     0   :  { %10 = vsyncpa [#allocation3], 0  ;;  %s231_s0 = inlined_call_operand.vmem [shape: f32[8,32], index: 0, kind: input, shape index: {}]   ;;  %s232_s1 = inlined_call_operand.vmem [shape: f32[32,16], index: 1, kind: input, shape index: {}]   ;;  %s233_s2 = inlined_call_operand.vmem [shape: f32[1,16], index: 2, kind: input, shape index: {}]   ;;  %s234_s3 = inlined_call_operand.hbm [shape: f32[8,16], index: 3, kind: output, shape index: {0}]   ;;  %s235_s4 = inlined_call_operand.hbm [shape: f32[8,16], index: 4, kind: output, shape index: {1}]  }
   0x1   :  { %v22_v0 = vld [vmem:[%s232_s1 + $0x18] sm:$0xff]  ;;  %v21_v1 = vld [vmem:[%s232_s1 + $0x10] sm:$0xff]  ;;  %v20_v2 = vld [vmem:[%s232_s1 + $0x8] sm:$0xff] }
   0x2   :  { %43 = vmatpush.msra.mxu0 %v22_v0 }
   0x3   :  { %11 = vsyncpa [#allocation5], 0  ;;  %v19_v3 = vld [vmem:[%s232_s1] sm:$0xff]  ;;  %vm27_vm0 = vcmask 261120   ;;  %vm51_vm1 = vcmask 130048   ;;  %s89_s28 = sshll.u32 %s234_s3, 4  ;;  %s90_s28 = int_to_ptr.hbm [resolvable:$true] %s89_s28 }
   0x4   :  { %44 = vmatpush.msra.mxu0 %v21_v1  ;;  %v18_v4 = vld [vmem:[%s231_s0] sm:$0xff]  ;;  %s176_s0 = smov [#allocation2]   ;;  %s177_s29 = smov [#allocation4]  }
   0x5   :  { %v117_v5 = vld [vmem:[%s233_s2] ss:$0 sm:$0xff]  ;;  %s87_s1 = sshll.u32 %s176_s0, 4  ;;  %s98_s30 = sshll.u32 %s177_s29, 4  ;;  %s88_s1 = int_to_ptr.vmem [resolvable:$true] %s87_s1  ;;  %s99_s30 = int_to_ptr.vmem [resolvable:$true] %s98_s30 }
   0x6   :  { %45 = vmatpush.msra.mxu0 %v20_v2  ;;  %s100_s6 = sshll.u32 %s235_s4, 4  ;;  %s101_s6 = int_to_ptr.hbm [resolvable:$true] %s100_s6 }
   0x8   :  { %46 = vmatpush.msra.mxu0 %v19_v3 }
   0x9   :  { %114 = vmatmul.msk.f32.vlgmr.msra.gmra.mxu0 %vm27_vm0, %v18_v4 }
  0x86   :  { %v48_v6 = vpop.f32.mrf.mxu0 }
  0x87   :  { %v49_v7 = vadd.f32 %v117_v5, %v48_v6 }
  0x89   :  { %v52_v8 = vsel %vm51_vm1, %v49_v7, -inf }
  0x8a   :  { %53 = vmax.xlane.f32.xlu0 %v52_v8 }
  0xfd   :  { %v54_v9 = vpop.xlane.xlu0 %53 }
  0xfe   :  { %v55_v10 = vsub.f32 %v49_v7, %v54_v9 }
 0x100   :  { %v56_v11 = vmul.f32 1.442695, %v55_v10 }
 0x102   :  { %118 = vpow2.f32 %v56_v11 }
 0x108   :  { %v119_v12 = vpop.eup %118 }
 0x109   :  { %v58_v13 = vsel %vm51_vm1, %v119_v12, 0.0 }
 0x10a   :  { %59 = vadd.xlane.f32.xlu0 %v58_v13 }
 0x17d   :  { %v60_v14 = vpop.xlane.xlu0 %59 }
 0x17e   :  { %120 = vrcp.f32 %v60_v14  ;;  %v72_v20 = vand.u32 2147483648, %v60_v14  ;;  %v70_v23 = vand.u32 2147483647, %v60_v14  ;;  %vm66_vm3 = vweird.f32 %v60_v14 }
 0x17f   :  { %122 = vlog2.f32 %v60_v14 }
 0x180   :  { %v73_v25 = vor.u32 1.1754944e-38, %v72_v20  ;;  %vm71_vm5 = vcmp.eq.f32.partialorder %v70_v23, 8.507059e+37 }
 0x184   :  { %v121_v15 = vpop.eup %120 }
 0x185   :  { %v123_v16 = vpop.eup %122  ;;  %v62_v17 = vmul.f32 %v121_v15, %v60_v14  ;;  %vm67_vm2 = vweird.f32 %v121_v15 }
 0x186   :  { %v77_v18 = vmul.f32 0.6931472, %v123_v16  ;;  %vm68_vm4 = vmor %vm66_vm3, %vm67_vm2 }
 0x187   :  { %v63_v19 = vsub.f32 1.0, %v62_v17 }
 0x188   :  { %v78_v21 = vsub.f32 %v55_v10, %v77_v18 }
 0x189   :  { %v64_v22 = vmul.f32 %v121_v15, %v63_v19 }
 0x18a   :  { %79 = vst.msk [vmem:[#allocation2] sm:$0xff] %vm51_vm1, %v78_v21 }
 0x18b   :  { %v65_v24 = vadd.f32 %v121_v15, %v64_v22  ;;  %92 = dma.vmem_to_hbm [thread:$0]  %s88_s1, 128, %s90_s28, [#allocation3]  }
 0x18d   :  { %v69_v26 = vsel %vm68_vm4, %v121_v15, %v65_v24 }
 0x18e   :  { %v74_v27 = vsel %vm71_vm5, %v73_v25, %v69_v26 }
 0x18f   :  { %v80_v28 = vmul.f32 %v119_v12, %v74_v27 }
 0x191   :  { %81 = vst.msk [vmem:[#allocation4] sm:$0xff] %vm51_vm1, %v80_v28 }
 0x192   :  { %103 = dma.vmem_to_hbm [thread:$0]  %s99_s30, 128, %s101_s6, [#allocation5]  }
 0x193   :  { %172 = dma.done.wait [#allocation3], 128  }
 0x194   :  { %173 = vsyncadd [#allocation3], 4294967168 }
 0x195   :  { %174 = dma.done.wait [#allocation5], 128  }
 0x196   :  { %175 = vsyncadd [#allocation5], 4294967168 }
 0x197   :  { %112 = vsyncpa [#allocation3], 1 }
 0x198   :  { %113 = vsyncpa [#allocation5], 1 }

</bundles_post_ra>
